<compile_context>
chip_gen: v6e
topology: v6e:2x2x1
jax: 0.10.0
libtpu: 0.0.40
codegen_flags: <defaults>
</compile_context>

<pallas_src>
import jax
import jax.numpy as jnp
import numpy as np
from jax.experimental import pallas as pl
from jax.experimental.pallas import tpu as pltpu


def _invconv_kernel_mxu(w_ref, x_ref, o_ref):
    # w_ref: (C, C) weight (out_ch, in_ch), resident across the grid.
    # x_ref: (1, C, TL) activation tile; o_ref: (1, C, TL) output tile.
    o_ref[0] = jnp.dot(
        w_ref[...], x_ref[0], preferred_element_type=jnp.float32
    ).astype(o_ref.dtype)


def _invconv_kernel_vpu(w_ref, x_ref, o_ref):
    # Small-C path: out[o, :] = sum_i w[o, i] * x[i, :] as C broadcast MACs
    # on the VPU (MXU would be almost entirely idle for a 4-wide contraction).
    x = x_ref[0]          # (C, TL)
    w = w_ref[...]        # (C, C)
    c = x.shape[0]
    acc = w[:, 0:1] * x[0:1, :]            # (C,1)*(1,TL) -> (C,TL)
    for i in range(1, c):                  # unrolled: C is small & static
        acc = acc + w[:, i:i + 1] * x[i:i + 1, :]
    o_ref[0] = acc.astype(o_ref.dtype)


def _choose_spatial_tile(spatial, c, dtype_bytes, vmem_budget_bytes):
    # Live buffers per step: double-buffered input + output tiles = 4 * (C, TL).
    max_tl = vmem_budget_bytes // (4 * c * dtype_bytes)
    max_tl = max(128, (max_tl // 128) * 128)
    target = min(4096, max_tl)                 # amortize ~0.35us per-step cost
    min_needed = pl.cdiv(spatial, 128) * 128   # don't over-tile tiny inputs
    return min(target, min_needed)


def invconv2d_forward(x, weight):
    """Forward pass of InvConv2d.

    Args:
      x: (N, C, H, W) float32 input (NCHW, like PyTorch).
      weight: (C, C, 1, 1) float32 conv weight (out_ch, in_ch, 1, 1).
    Returns:
      (out, logdet) where out is (N, C, H, W) and logdet is a scalar equal to
      H * W * slogdet(weight.squeeze())[1].
    """
    n, c, h, w = x.shape
    w2d = weight.reshape(c, c)        # (out_ch, in_ch)
    sp = h * w

    # View as (N, C, spatial); pad spatial up to a tile multiple if needed.
    x3 = x.reshape(n, c, sp)
    dtype_bytes = jnp.dtype(x.dtype).itemsize
    # Tile budget chosen for the smallest-VMEM generation (v7x: 64 MiB phys).
    tl = _choose_spatial_tile(sp, c, dtype_bytes,
                              vmem_budget_bytes=32 * 1024 * 1024)
    n_sp = pl.cdiv(sp, tl)
    sp_pad = n_sp * tl
    if sp_pad != sp:
        x3 = jnp.pad(x3, ((0, 0), (0, 0), (0, sp_pad - sp)))

    kernel = _invconv_kernel_vpu if c <= 8 else _invconv_kernel_mxu

    out3 = pl.pallas_call(
        kernel,
        out_shape=jax.ShapeDtypeStruct((n, c, sp_pad), x.dtype),
        grid_spec=pltpu.PrefetchScalarGridSpec(
            num_scalar_prefetch=0,
            grid=(n, n_sp),
            in_specs=[
                pl.BlockSpec((c, c), lambda b, s: (0, 0)),         # weight
                pl.BlockSpec((1, c, tl), lambda b, s: (b, 0, s)),  # activations
            ],
            out_specs=pl.BlockSpec((1, c, tl), lambda b, s: (b, 0, s)),
        ),
        compiler_params=pltpu.CompilerParams(
            dimension_semantics=("parallel", "parallel"),
            vmem_limit_bytes=48 * 1024 * 1024,   # raise v5e's 16 MiB default
        ),
    )(w2d, x3)

    out = out3[:, :, :sp].reshape(n, c, h, w)

    # TODO(synk): PyTorch computes slogdet in float64; TPU has no native f64,
    # so slogdet is done in float32 (weight is orthogonal at init -> logdet~0).
    _, logabsdet = jnp.linalg.slogdet(w2d)
    logdet = jnp.float32(h * w) * logabsdet.astype(jnp.float32)
    return out, logdet


def make_invconv2d_weight(key, in_channel):
    """Deterministic init matching the PyTorch module: QR of a random matrix."""
    w0 = jax.random.normal(key, (in_channel, in_channel), dtype=jnp.float32)
    q, _ = jnp.linalg.qr(w0)
    return q.reshape(in_channel, in_channel, 1, 1)


if __name__ == "__main__":
    key = jax.random.PRNGKey(0)
    k_w, k_x = jax.random.split(key)

    N, C, H, W = 2, 4, 16, 16
    weight = make_invconv2d_weight(k_w, C)
    x = jax.random.normal(k_x, (N, C, H, W), dtype=jnp.float32)

    out, logdet = jax.jit(invconv2d_forward)(x, weight)
    out = jax.block_until_ready(out)
    logdet = jax.block_until_ready(logdet)

    # Silent correctness check against a pure-JAX reference (1x1 conv == einsum).
    ref = jnp.einsum("oc,nchw->nohw", weight.reshape(C, C), x)
    np.testing.assert_allclose(np.asarray(out), np.asarray(ref), rtol=1e-5, atol=1e-5)
    _, ref_logdet = jnp.linalg.slogdet(weight.reshape(C, C))
    np.testing.assert_allclose(np.asarray(logdet), H * W * np.asarray(ref_logdet),
                               rtol=1e-4, atol=1e-4)

    print("KERNEL_OK")
</pallas_src>

<mosaic_0001>
module attributes {stable_mosaic.version = 11 : i64} {
  func.func @_invconv_kernel_vpu(%arg0: i32, %arg1: i32, %arg2: memref<4x4xf32, #tpu.memory_space<vmem>>, %arg3: memref<1x4x256xf32, #tpu.memory_space<vmem>>, %arg4: memref<1x4x256xf32, #tpu.memory_space<vmem>>) attributes {dimension_semantics = [#tpu.dimension_semantics<parallel>, #tpu.dimension_semantics<parallel>], iteration_bounds = array<i64: 2, 1>, scalar_prefetch = 0 : i64, scratch_operands = 0 : i64, tpu.core_type = #tpu.core_type<tc>, window_params = [{pipeline_mode = #tpu.pipeline_mode<synchronous>, transform_indices = @transform_0, window_bounds = array<i64: 4, 4>}, {transform_indices = @transform_1, window_bounds = array<i64: 1, 4, 256>}, {transform_indices = @transform_2, window_bounds = array<i64: 1, 4, 256>}]} {
    %c0 = arith.constant 0 : index
    %c0_0 = arith.constant 0 : index
    %c0_1 = arith.constant 0 : index
    %0 = vector.load %arg3[%c0, %c0_0, %c0_1] : memref<1x4x256xf32, #tpu.memory_space<vmem>>, vector<1x4x256xf32>
    %1 = vector.shape_cast %0 : vector<1x4x256xf32> to vector<4x256xf32>
    %c0_2 = arith.constant 0 : index
    %c0_3 = arith.constant 0 : index
    %2 = vector.load %arg2[%c0_2, %c0_3] : memref<4x4xf32, #tpu.memory_space<vmem>>, vector<4x4xf32>
    %3 = vector.extract_strided_slice %2 {offsets = [0, 0], sizes = [4, 1], strides = [1, 1]} : vector<4x4xf32> to vector<4x1xf32>
    %4 = vector.extract_strided_slice %1 {offsets = [0, 0], sizes = [1, 256], strides = [1, 1]} : vector<4x256xf32> to vector<1x256xf32>
    %5 = vector.broadcast %3 : vector<4x1xf32> to vector<4x256xf32>
    %6 = vector.broadcast %4 : vector<1x256xf32> to vector<4x256xf32>
    %7 = arith.mulf %5, %6 : vector<4x256xf32>
    %8 = vector.extract_strided_slice %2 {offsets = [0, 1], sizes = [4, 1], strides = [1, 1]} : vector<4x4xf32> to vector<4x1xf32>
    %9 = vector.extract_strided_slice %1 {offsets = [1, 0], sizes = [1, 256], strides = [1, 1]} : vector<4x256xf32> to vector<1x256xf32>
    %10 = vector.broadcast %8 : vector<4x1xf32> to vector<4x256xf32>
    %11 = vector.broadcast %9 : vector<1x256xf32> to vector<4x256xf32>
    %12 = arith.mulf %10, %11 : vector<4x256xf32>
    %13 = arith.addf %7, %12 : vector<4x256xf32>
    %14 = vector.extract_strided_slice %2 {offsets = [0, 2], sizes = [4, 1], strides = [1, 1]} : vector<4x4xf32> to vector<4x1xf32>
    %15 = vector.extract_strided_slice %1 {offsets = [2, 0], sizes = [1, 256], strides = [1, 1]} : vector<4x256xf32> to vector<1x256xf32>
    %16 = vector.broadcast %14 : vector<4x1xf32> to vector<4x256xf32>
    %17 = vector.broadcast %15 : vector<1x256xf32> to vector<4x256xf32>
    %18 = arith.mulf %16, %17 : vector<4x256xf32>
    %19 = arith.addf %13, %18 : vector<4x256xf32>
    %20 = vector.extract_strided_slice %2 {offsets = [0, 3], sizes = [4, 1], strides = [1, 1]} : vector<4x4xf32> to vector<4x1xf32>
    %21 = vector.extract_strided_slice %1 {offsets = [3, 0], sizes = [1, 256], strides = [1, 1]} : vector<4x256xf32> to vector<1x256xf32>
    %22 = vector.broadcast %20 : vector<4x1xf32> to vector<4x256xf32>
    %23 = vector.broadcast %21 : vector<1x256xf32> to vector<4x256xf32>
    %24 = arith.mulf %22, %23 : vector<4x256xf32>
    %25 = arith.addf %19, %24 : vector<4x256xf32>
    %c0_4 = arith.constant 0 : index
    %c0_5 = arith.constant 0 : index
    %c0_6 = arith.constant 0 : index
    %26 = vector.load %arg4[%c0_4, %c0_5, %c0_6] : memref<1x4x256xf32, #tpu.memory_space<vmem>>, vector<1x4x256xf32>
    %27 = vector.shape_cast %26 : vector<1x4x256xf32> to vector<4x256xf32>
    %28 = vector.shape_cast %25 : vector<4x256xf32> to vector<1x4x256xf32>
    tpu.vector_store %arg4[%c0_4, %c0_5, %c0_6], %28 {strides = array<i32>} : memref<1x4x256xf32, #tpu.memory_space<vmem>>, vector<1x4x256xf32>,
    return
  }
  func.func @transform_0(%arg0: i32, %arg1: i32) -> (i32, i32) {
    %c0_i32 = arith.constant 0 : i32
    %c0_i32_0 = arith.constant 0 : i32
    %c0_i32_1 = arith.constant 0 : i32
    return %c0_i32, %c0_i32_0 : i32, i32
  }
  func.func @transform_1(%arg0: i32, %arg1: i32) -> (i32, i32, i32) {
    %c0_i32 = arith.constant 0 : i32
    %c0_i32_0 = arith.constant 0 : i32
    return %arg0, %c0_i32, %arg1 : i32, i32, i32
  }
  func.func @transform_2(%arg0: i32, %arg1: i32) -> (i32, i32, i32) {
    %c0_i32 = arith.constant 0 : i32
    %c0_i32_0 = arith.constant 0 : i32
    return %arg0, %c0_i32, %arg1 : i32, i32, i32
  }
}

</mosaic_0001>

<bundles_post_ra>
// kernel: custom-call.2
= control target key start
LH: loop header
LB: loop body
LE: loop exit
PB: predicated region body
PF: predicated region fallthrough
CT: control target
= control target key end

     0   :  { %5 = vsyncpa [#allocation6], 0  ;;  %s549_s0 = inlined_call_operand.vmem [shape: f32[4,4], index: 0, kind: input, shape index: {}]   ;;  %s550_s1 = inlined_call_operand.vmem [shape: f32[4,4], index: 1, kind: output, shape index: {0}]   ;;  %s551_s2 = inlined_call_operand.hbm [shape: s32[4], index: 2, kind: output, shape index: {1}]   ;;  %s552_s3 = inlined_call_operand.hbm [shape: s32[4], index: 3, kind: output, shape index: {2}]  }
   0x1   :  { %6 = vsyncpa [#allocation9], 0  ;;  %v68_v0 = vld [vmem:[%s549_s0] sm:$0xf]  ;;  %v78_v1 = vlaneseq  ;;  %v478_v2 = vmov 0   ;;  %s508_s14 = smov 0  }
   0x2   :  { %69 = vst [vmem:[#allocation1] sm:$0xf] %v68_v0  ;;  %77 = vst [vmem:[#allocation4] sm:$0x1] %v478_v2 }
   0x3   :  { %v505_v3 = vshrl.u32 %v78_v1, 7 }
   0x5   :  { %82 = vst [vmem:[#allocation10] sm:$0xff] %v505_v3 }
   0x9   :  { %v73_v4 = vld [vmem:[#allocation1] sm:$0xf] }
   0xa   :  { %74 = vst [vmem:[#allocation0] sm:$0xf] %v73_v4 }
  0x11   :  { %v75_v5 = vld [vmem:[#allocation0] sm:$0xff] }
  0x12   :  { %76 = vst [vmem:[#allocation2] sm:$0xff] %v75_v5 }
  0x13 LB: > { %vm98_vm0 = vcmp.lt.s32.totalorder %v505_v3, 4  ;;  %v515_v8 = vstv %s476_s14  ;;  %s139_s0 = ssub.s32 128, %s476_s14  ;;  %v145_v38 = vand.u32 127, %v78_v1  ;;  %v148_v40 = vld [vmem:[#allocation4] ss:$0 sm:$0xff]  ;;  %s151_s15 = scalar_lea.vmem [#allocation2], %s476_s14  ;;  %s476_s14 = sphi %s508_s14, %s88_s14  }
  0x14   : > { %vm97_vm1 = vcmp.ge.s32.totalorder %v505_v3, %v515_v8  ;;  %s157_s17 = scalar_lea.vmem [#allocation10], %s476_s14  ;;  %vm177_vm15 = vcmp.gt.s32.totalorder %v505_v3, %v515_v8  ;;  %s88_s14 = sadd.s32 1, %s476_s14  }
  0x15   : > { %vm99_vm3 = vmand %vm97_vm1, %vm98_vm0  ;;  %vm169_vm12 = vcmp.gt.s32.totalorder %v145_v38, %v515_v8  ;;  %vm146_vm13 = vcmp.eq.s32.totalorder %v145_v38, %v515_v8  ;;  %v159_v42 = vld [vmem:[%s157_s17] ss:$0 sm:$0xff]  ;;  %p85_p0 = scmp.ge.s32.totalorder %s88_s14, 4  }
  0x16   : > { %vm181_vm1 = vmand %vm177_vm15, %vm146_vm13  ;;  %s479_s20 = smov (%p85_p0), [#allocation5]  }
  0x17   :  { %s329_s21 = sshll.u32 (%p85_p0), %s479_s20, 4  ;;  %s330_s21 = int_to_ptr.vmem [resolvable:$true] %s329_s21 }
  0x18   :  { %s426_s22 = scalar_lea.vmem (%p85_p0), %s330_s21, 16  ;;  %s430_s23 = scalar_lea.vmem (%p85_p0), %s330_s21, 32 }
  0x19   : > { %v93_v6 = vld [vmem:[#allocation2] sm:$0xff]  ;;  %v153_v41 = vld [vmem:[%s151_s15] ss:$0 sm:$0xff]  ;;  %p427_p1 = scmp.ne.s32.totalorder (%p85_p0), %s330_s21, %s426_s22  ;;  %p431_p2 = scmp.lt.s32.totalorder (%p85_p0), %s330_s21, %s330_s21 }
  0x1a   : > { %v94_v7 = vand.u32 2147483647, %v93_v6  ;;  %p432_p3 = scmp.lt.s32.totalorder (%p85_p0), %s430_s23, %s426_s22 }
  0x1c   : > { %vm407_vm2 = vcmp.gt.f32.partialorder %v94_v7, -inf  ;;  %p433_p4 = por (%p85_p0), %p432_p3, %p431_p2 }
  0x1d   : > { %vm101_vm4 = vmand %vm99_vm3, %vm407_vm2 }
  0x1e   : > { %v102_v9 = vsel %vm101_vm4, %v505_v3, %v515_v8  ;;  %v103_v10 = vsel %vm101_vm4, %v94_v7, -inf  ;;  %p434_p5 = pnand (%p85_p0), %p433_p4, %p427_p1 }
  0x1f   : > { %v104_v11 = vrot.slane %v103_v10, 1  ;;  %v105_v12 = vrot.slane %v102_v9, 1 }
  0x21   : > { %vm106_vm5 = vcmp.ge.f32.partialorder %v104_v11, %v103_v10  ;;  %v109_v13 = vrot.slane %v104_v11, 1  ;;  %v110_v14 = vrot.slane %v105_v12, 1 }
  0x22   : > { %v107_v15 = vsel %vm106_vm5, %v104_v11, %v103_v10  ;;  %v108_v16 = vsel %vm106_vm5, %v105_v12, %v102_v9 }
  0x23   : > { %vm111_vm6 = vcmp.ge.f32.partialorder %v109_v13, %v107_v15  ;;  %v114_v17 = vrot.slane %v109_v13, 1  ;;  %v115_v18 = vrot.slane %v110_v14, 1 }
  0x24   : > { %v112_v19 = vsel %vm111_vm6, %v109_v13, %v107_v15  ;;  %v113_v20 = vsel %vm111_vm6, %v110_v14, %v108_v16 }
  0x25   : > { %vm116_vm7 = vcmp.ge.f32.partialorder %v114_v17, %v112_v19  ;;  %v119_v21 = vrot.slane %v114_v17, 1  ;;  %v120_v22 = vrot.slane %v115_v18, 1 }
  0x26   : > { %v117_v23 = vsel %vm116_vm7, %v114_v17, %v112_v19  ;;  %v118_v24 = vsel %vm116_vm7, %v115_v18, %v113_v20 }
  0x27   : > { %vm121_vm8 = vcmp.ge.f32.partialorder %v119_v21, %v117_v23  ;;  %v124_v25 = vrot.slane %v119_v21, 1  ;;  %v125_v26 = vrot.slane %v120_v22, 1 }
  0x28   : > { %v122_v27 = vsel %vm121_vm8, %v119_v21, %v117_v23  ;;  %v123_v28 = vsel %vm121_vm8, %v120_v22, %v118_v24 }
  0x29   : > { %vm126_vm9 = vcmp.ge.f32.partialorder %v124_v25, %v122_v27  ;;  %v129_v29 = vrot.slane %v124_v25, 1  ;;  %v130_v30 = vrot.slane %v125_v26, 1 }
  0x2a   : > { %v127_v31 = vsel %vm126_vm9, %v124_v25, %v122_v27  ;;  %v128_v32 = vsel %vm126_vm9, %v125_v26, %v123_v28 }
  0x2b   : > { %vm131_vm10 = vcmp.ge.f32.partialorder %v129_v29, %v127_v31  ;;  %v134_v33 = vrot.slane %v129_v29, 1  ;;  %v135_v34 = vrot.slane %v130_v30, 1 }
  0x2c   : > { %v132_v35 = vsel %vm131_vm10, %v129_v29, %v127_v31  ;;  %v133_v36 = vsel %vm131_vm10, %v130_v30, %v128_v32 }
  0x2d   : > { %vm136_vm11 = vcmp.ge.f32.partialorder %v134_v33, %v132_v35 }
  0x2e   : > { %v138_v37 = vsel %vm136_vm11, %v135_v34, %v133_v36 }
  0x2f   : > { %140 = vrot.lane.b32.xlu0 %v138_v37, %s139_s0 }
  0xa1   : > { %v141_v39 = vpop.permute.xlu0 %140 }
  0xa2   : > { %411 = vpush %v141_v39 }
  0xd3   : > { %s412_s16 = spop %411 }
  0xd4   : > { %v147_v43 = vstv %s412_s16  ;;  %s152_s18 = scalar_lea.vmem [#allocation2], %s412_s16  ;;  %s158_s19 = scalar_lea.vmem [#allocation10], %s412_s16 }
  0xd5   : > { %v154_v44 = vld [vmem:[%s152_s18] ss:$0 sm:$0xff]  ;;  %v149_v46 = vsel %vm146_vm13, %v147_v43, %v148_v40 }
  0xd6   : > { %v160_v45 = vld [vmem:[%s158_s19] ss:$0 sm:$0xff]  ;;  %155 = vst [vmem:[%s152_s18] sm:$0x1] %v153_v41  ;;  %vm163_vm14 = vcmp.ne.f32.partialorder %v154_v44, 0.0  ;;  %150 = vst [vmem:[#allocation4] sm:$0x1] %v149_v46 }
  0xd7   : > { %161 = vst [vmem:[%s158_s19] sm:$0x1] %v159_v42  ;;  %156 = vst [vmem:[%s151_s15] sm:$0x1] %v154_v44  ;;  %v170_v53 = vsel %vm169_vm12, %v154_v44, 0.0 }
  0xd8   : > { %162 = vst [vmem:[%s157_s17] sm:$0x1] %v160_v45  ;;  %vm164_vm0 = vmand %vm146_vm13, %vm163_vm14 }
  0xd9   : > { %v165_v47 = vsel %vm164_vm0, %v154_v44, 1.0 }
  0xda   : > { %v178_v48 = vsel %vm177_vm15, %v165_v47, 1.0 }
  0xdb   : > { %424 = vrcp.f32 %v178_v48 }
  0xdd   :  { %v249_v59 = vld [vmem:[#allocation4] sm:$0x1] (%p85_p0) }
  0xde   : > { %v174_v50 = vld [vmem:[#allocation2] sm:$0xff]  ;;  %252 = vst [vmem:[#allocation5] sm:$0x1] (%p85_p0), %v249_v59 }
  0xdf   :  { %v188_v57 = vld [vmem:[#allocation10] sm:$0xff] (%p85_p0) }
  0xe8   : > { %v425_v49 = vpop.eup %424 }
  0xe9   : > { %v180_v51 = vmul.f32 %v425_v49, %v174_v50 }
  0xeb   : > { %v182_v52 = vsel %vm181_vm1, %v180_v51, 0.0 }
  0xec   : > { %183 = vadd.xlane.f32.xlu0 %v182_v52 }
 0x119   :  { %204 = vxpose.xlu0.b32.start.end [1/1] (short) (narrow) (%p85_p0), %v188_v57, 8 }
 0x175   : > { %v184_v54 = vpop.xlane.xlu0 %183 }
 0x176   : > { %v185_v55 = vmul.f32 %v184_v54, %v170_v53  ;;  %87 = sbr.rel (!%p85_p0) target bundleno = 19 (0x13), region = 134 }
 0x178   : > { %v186_v56 = vsub.f32 %v180_v51, %v185_v55 }
 0x17a   : > { %187 = vst [vmem:[#allocation2] sm:$0xff] %v186_v56 }
 0x181   :  { %v241_v58 = vld [vmem:[#allocation2] sm:$0xf] }
 0x182   :  { %244 = vst [vmem:[#allocation3] sm:$0xf] %v241_v58 }
 0x183   :  { %437 = shalt.err (!%p434_p5)
}
 0x184   :  { %332 = dma.vmem_to_hbm [thread:$0]  %s330_s21, 16, %s551_s2, [#allocation6]  }
 0x185   :  { %s480_s28 = smov [#allocation8]  }
 0x186   :  { %s338_s29 = sshll.u32 %s480_s28, 4  ;;  %s339_s29 = int_to_ptr.vmem [resolvable:$true] %s338_s29 }
 0x187   :  { %s446_s30 = scalar_lea.vmem %s339_s29, 16  ;;  %s450_s4 = scalar_lea.vmem %s339_s29, 32 }
 0x188   :  { %p447_p6 = scmp.ne.s32.totalorder %s339_s29, %s446_s30  ;;  %p451_p7 = scmp.lt.s32.totalorder %s339_s29, %s339_s29 }
 0x189   :  { %v322_v60 = vld [vmem:[#allocation3] sm:$0xf]  ;;  %p452_p8 = scmp.lt.s32.totalorder %s450_s4, %s446_s30 }
 0x18a   :  { %323 = vst [vmem:[%s550_s1] sm:$0xf] %v322_v60 }
 0x18b   :  { %p453_p9 = por %p452_p8, %p451_p7 }
 0x18d   :  { %p454_p10 = pnand %p453_p9, %p447_p6 }
 0x195   :  { %v220_v61 = vpop.trf.xlu0 }
 0x196   :  { %236 = vst [vmem:[#allocation7] sm:$0x1] %v220_v61 }
 0x19d   :  { %v257_v62 = vld [vmem:[#allocation7] sm:$0x1] }
 0x19e   :  { %260 = vst [vmem:[#allocation8] sm:$0x1] %v257_v62 }
 0x19f   :  { %457 = shalt.err (!%p454_p10)
}
 0x1a0   :  { %341 = dma.vmem_to_hbm [thread:$0]  %s339_s29, 16, %s552_s3, [#allocation9]  }
 0x1a1   :  { %470 = dma.done.wait [#allocation6], 16  }
 0x1a2   :  { %471 = vsyncadd [#allocation6], 4294967280 }
 0x1a3   :  { %472 = dma.done.wait [#allocation9], 16  }
 0x1a4   :  { %473 = vsyncadd [#allocation9], 4294967280 }
 0x1a5   :  { %348 = vsyncpa [#allocation6], 1 }
 0x1a6   :  { %349 = vsyncpa [#allocation9], 1 }

// kernel: invconv2d_forward.1
= control target key start
LH: loop header
LB: loop body
LE: loop exit
PB: predicated region body
PF: predicated region fallthrough
CT: control target
= control target key end

     0   :  { %s470_s9 = smov 0   ;;  %s472_s10 = smov 0   ;;  %s513_s0 = inlined_call_operand.vmem [shape: f32[4,4], index: 0, kind: input, shape index: {}]   ;;  %s514_s1 = inlined_call_operand.vmem [shape: f32[2,4,256], index: 1, kind: input, shape index: {}]   ;;  %s515_s2 = inlined_call_operand.vmem [shape: f32[2,4,256], index: 2, kind: output, shape index: {}]  }
   0x1   :  { %s474_s11 = smov 0  }
   0x2 LB: > { %s24_s12 = sadd.s32 1, %s445_s10  ;;  %p385_p0 = scmp.ge.s32.totalorder %s449_s11, 1  ;;  %s449_s11 = sphi %s474_s11, %s12_s11   ;;  %s445_s10 = sphi %s472_s10, %s517_s10   ;;  %s441_s9 = sphi %s470_s9, %s516_s9  }
   0x3   : > { %p26_p1 = scmp.ge.s32.totalorder %s24_s12, 2  ;;  %p133_p2 = scmp.lt.s32.totalorder %s449_s11, 3 }
   0x5   : > { %s519_s12 = smov (%p26_p1, %s24_s12), 0  ;;  %p134_p3 = pnand %p385_p0, %p133_p2 }
   0x6   : > { %p164_p4 = scmp.lt.s32.totalorder (!%p134_p3), %s441_s9, 1 }
   0x7   : > { %137 = sbr.rel (%p134_p3) target bundleno = 154 (0x9a), region = 28 }
   0xc   : > { %v184_v0 = vld [vmem:[%s513_s0] sm:$0xf]  ;;  %v451_v1 = vmov 0   ;;  %v452_v2 = vmov 2   ;;  %v453_v3 = vmov 1   ;;  %v454_v4 = vmov 3  }
   0xd   : > { %422 = vset.pattern.permute.xlu0 %v451_v1  ;;  %424 = vset.pattern.permute.xlu1 %v452_v2  ;;  %s521_s9 = smov (!%p164_p4, %s441_s9), 1  ;;  %v191_v5 = vlaneseq }
   0xe   : > { %187 = vperm.xlu0 %422, %v184_v0   ;;  %238 = vperm.xlu1 %424, %v184_v0   ;;  %s392_s15 = sshll.u32 %s521_s9, 3 }
   0xf   : > { %v192_v6 = vshrl.u32 %v191_v5, 7  ;;  %s171_s18 = scalar_lea.vmem %s514_s1, %s392_s15  ;;  %s181_s21 = scalar_lea.vmem %s515_s2, %s392_s15 }
  0x10   : > { %v183_v11 = vld [vmem:[%s171_s18] sm:$0xff] }
  0x11   : > { %v193_v7 = vsub.s32 0, %v192_v6  ;;  %v197_v8 = vsub.s32 4, %v192_v6  ;;  %v217_v9 = vsub.s32 1, %v192_v6  ;;  %v221_v10 = vsub.s32 5, %v192_v6 }
  0x12   : > { %423 = vset.pattern.permute.xlu0 %v453_v3  ;;  %425 = vset.pattern.permute.xlu1 %v454_v4  ;;  %v243_v12 = vsub.s32 2, %v192_v6  ;;  %v247_v13 = vsub.s32 6, %v192_v6  ;;  %v269_v14 = vsub.s32 3, %v192_v6  ;;  %v273_v15 = vsub.s32 7, %v192_v6 }
  0x13   : > { %212 = vperm.xlu0 %423, %v184_v0   ;;  %264 = vperm.xlu1 %425, %v184_v0   ;;  %v194_v16 = vrot.slane %v183_v11, %v193_v7  ;;  %v198_v17 = vrot.slane %v183_v11, %v197_v8  ;;  %v218_v18 = vrot.slane %v183_v11, %v217_v9 }
  0x14   : > { %v222_v19 = vrot.slane %v183_v11, %v221_v10  ;;  %v244_v20 = vrot.slane %v183_v11, %v243_v12  ;;  %v248_v21 = vrot.slane %v183_v11, %v247_v13  ;;  %v270_v24 = vrot.slane %v183_v11, %v269_v14 }
  0x15   : > { %v274_v25 = vrot.slane %v183_v11, %v273_v15  ;;  %v204_v26 = vrot.slane %v194_v16, %v193_v7  ;;  %v208_v27 = vrot.slane %v198_v17, %v193_v7  ;;  %v228_v28 = vrot.slane %v218_v18, %v217_v9 }
  0x16   : > { %v232_v29 = vrot.slane %v222_v19, %v217_v9  ;;  %v254_v30 = vrot.slane %v244_v20, %v243_v12  ;;  %v258_v31 = vrot.slane %v248_v21, %v243_v12  ;;  %v280_v32 = vrot.slane %v270_v24, %v269_v14 }
  0x17   : > { %426 = vset.pattern.permute.xlu0 %v454_v4  ;;  %v284_v33 = vrot.slane %v274_v25, %v269_v14 }
  0x89   : > { %v188_v22 = vpop.permute.xlu0 %187  ;;  %v239_v23 = vpop.permute.xlu1 %238 }
  0x8a   : > { %v209_v36 = vmul.f32 %v204_v26, %v188_v22  ;;  %v210_v37 = vmul.f32 %v208_v27, %v188_v22  ;;  %v259_v40 = vmul.f32 %v254_v30, %v239_v23  ;;  %v260_v41 = vmul.f32 %v258_v31, %v239_v23 }
  0x8e   : > { %v213_v34 = vpop.permute.xlu0 %212  ;;  %v265_v35 = vpop.permute.xlu1 %264 }
  0x8f   : > { %v233_v38 = vmul.f32 %v228_v28, %v213_v34  ;;  %v234_v39 = vmul.f32 %v232_v29, %v213_v34  ;;  %v285_v44 = vmul.f32 %v280_v32, %v265_v35  ;;  %v286_v45 = vmul.f32 %v284_v33, %v265_v35 }
  0x91   : > { %v235_v42 = vadd.f32 %v233_v38, %v209_v36  ;;  %v236_v43 = vadd.f32 %v234_v39, %v210_v37 }
  0x93   : > { %v261_v46 = vadd.f32 %v259_v40, %v235_v42  ;;  %v262_v47 = vadd.f32 %v260_v41, %v236_v43 }
  0x95   : > { %v287_v48 = vadd.f32 %v285_v44, %v261_v46  ;;  %v288_v49 = vadd.f32 %v286_v45, %v262_v47 }
  0x97   : > { %v291_v50 = vcombine.low %v287_v48, %v288_v49 }
  0x99   : > { %293 = vst [vmem:[%s181_s21] sm:$0xff] %v291_v50 }
  0x9a PF: > { %s12_s11 = sadd.s32 1, %s449_s11   ;;  %s516_s9 = smov %s445_s10 }
  0x9b   : > { %p9_p5 = scmp.ge.s32.totalorder %s12_s11, 4   ;;  %s517_s10 = smov %s519_s12 }
  0x9d   :  { %11 = sbr.rel (!%p9_p5) target bundleno = 2 (0x2), region = 58 }

</bundles_post_ra>
